<compile_context>
chip_gen: v6e
topology: v6e:2x2x1
jax: 0.10.0
libtpu: 0.0.40
codegen_flags: <defaults>
</compile_context>

<pallas_src>
import functools

import numpy as np
import jax
import jax.numpy as jnp
from jax import lax
from jax.experimental import pallas as pl
from jax.experimental.pallas import tpu as pltpu


_TINY_OUTPUT_BYTES = 256 << 10   # below this, plain XLA gather wins outright
_GATHER_MAX_BLOCK = 32           # max concurrent row DMAs per grid step


def _round_up(x: int, m: int) -> int:
    return ((x + m - 1) // m) * m


def _vmem_capacity_bytes() -> int:
    """Per-core VMEM capacity (generation-aware), conservative fallback."""
    try:
        cap = int(getattr(pltpu.get_tpu_info(), "vmem_capacity_bytes", 0) or 0)
        if cap > 0:
            return cap
    except Exception:
        pass
    return 64 << 20  # v7x per-TC VMEM: the smallest of v5e/v6e/v7x


# ----------------------------------------------------------------------------
# Path A: per-row DMA gather (table stays in HBM; traffic ~= B*D*itemsize)
# ----------------------------------------------------------------------------
def _dma_gather_kernel(flat_ids_ref, table_hbm, out_ref, sem, *, block_b: int):
    """Gather block_b table rows from HBM straight into one output tile.

    flat_ids_ref : SMEM scalar-prefetch ref, (B_padded,) int32
    table_hbm    : raw HBM ref (memory_space=pl.ANY), (TR, D)
    out_ref      : VMEM output tile, (block_b, D)
    sem          : DMA semaphores, (block_b,)
    """
    base = pl.multiple_of(pl.program_id(0) * block_b, block_b)
    copies = []
    for j in range(block_b):                       # static unroll, overlapped DMAs
        rid = flat_ids_ref[base + j]               # SMEM scalar read
        cp = pltpu.make_async_copy(
            table_hbm.at[pl.ds(rid, 1)],           # (1, D) row in HBM
            out_ref.at[pl.ds(j, 1)],               # (1, D) row of the out tile
            sem.at[j])
        cp.start()
        copies.append(cp)
    for cp in copies:
        cp.wait()


# ----------------------------------------------------------------------------
# Path B: VMEM-resident table gather with dense per-sublane-group stores
# ----------------------------------------------------------------------------
def _resident_gather_kernel(flat_ids_ref, table_ref, out_ref, *,
                            block_b: int, sublane: int):
    """Gather block_b rows from the resident table into one output tile.

    Rows are assembled `sublane` at a time with an iota/where select so the
    writeback is one dense (sublane, D_pad) store per group instead of
    `sublane` single-sublane masked stores (store slot was the binding unit).
    """
    d = out_ref.shape[1]
    base = pl.multiple_of(pl.program_id(0) * block_b, block_b)
    sub_iota = lax.broadcasted_iota(jnp.int32, (sublane, d), 0)

    def group_body(g, carry):
        tile = jnp.zeros((sublane, d), out_ref.dtype)
        for r in range(sublane):                         # short static unroll
            rid = flat_ids_ref[base + g * sublane + r]   # SMEM scalar read
            row = table_ref[pl.ds(rid, 1), :]            # (1, d) in-VMEM load
            tile = jnp.where(sub_iota == r, row, tile)   # place into sublane r
        off = pl.multiple_of(g * sublane, sublane)
        out_ref[pl.ds(off, sublane), :] = tile           # dense store / group
        return carry

    lax.fori_loop(0, block_b // sublane, group_body, 0)


# ----------------------------------------------------------------------------
# Wrapper == TaskEmbeddingController.forward
# ----------------------------------------------------------------------------
def task_embedding_forward(emb_table: jax.Array,
                           task_ids: jax.Array,
                           row_ids: jax.Array,
                           *,
                           force_pallas: bool = False) -> jax.Array:
    """emb_table: [T, R, D]; task_ids, row_ids: [B] int32 -> [B, D] gather."""
    T, R, D = emb_table.shape
    B = int(task_ids.shape[0])
    dtype = emb_table.dtype
    itemsize = jnp.dtype(dtype).itemsize
    TR = T * R

    flat_table = emb_table.reshape(TR, D)
    # NOTE: PyTorch raises on an unknown task name; here bad task/row ids are
    # clamped to a valid row instead (documented divergence, never reads OOB).
    flat_ids = jnp.clip(
        task_ids.astype(jnp.int32) * R + row_ids.astype(jnp.int32), 0, TR - 1)

    out_bytes = B * D * itemsize
    table_bytes = TR * D * itemsize

    # --- tiny problems: pallas_call launch/pipeline overhead dominates -------
    if not force_pallas and out_bytes < _TINY_OUTPUT_BYTES:
        return flat_table[flat_ids]

    # --- resident-table path feasibility --------------------------------------
    sublane = {4: 8, 2: 16, 1: 32}.get(itemsize, 8)
    tr_padded = _round_up(TR, 8)
    d_padded = _round_up(D, 128)          # lane-dense output tile (dense vst)

    blk_res = sublane                      # grow output tile to ~512 KiB
    while (blk_res < 1024 and blk_res < B
           and 2 * (2 * blk_res) * d_padded * itemsize <= (1 << 20)):
        blk_res *= 2

    vmem_cap = _vmem_capacity_bytes()
    usable_vmem = (vmem_cap * 3) // 4
    resident_need = (2 * tr_padded * d_padded * itemsize   # table (assume 2x buffered)
                     + 2 * blk_res * d_padded * itemsize   # double-buffered out tile
                     + (4 << 20))                          # compiler headroom
    # The resident path streams the whole table from HBM once per call, so it
    # only pays off when the batch gathers at least that much data.
    use_resident = (resident_need <= usable_vmem) and (out_bytes >= table_bytes)

    if use_resident:
        b_padded = _round_up(B, blk_res)
        num_blocks = b_padded // blk_res
        ids_padded = jnp.zeros((b_padded,), jnp.int32).at[:B].set(flat_ids)
        table_p = flat_table
        if tr_padded != TR or d_padded != D:
            table_p = jnp.pad(flat_table,
                              ((0, tr_padded - TR), (0, d_padded - D)))

        out_padded = pl.pallas_call(
            functools.partial(_resident_gather_kernel,
                              block_b=blk_res, sublane=sublane),
            out_shape=jax.ShapeDtypeStruct((b_padded, d_padded), dtype),
            grid_spec=pltpu.PrefetchScalarGridSpec(
                num_scalar_prefetch=1,
                grid=(num_blocks,),
                in_specs=[
                    # Constant block index: table resident in VMEM, one HBM fetch.
                    pl.BlockSpec((tr_padded, d_padded), lambda b, ids: (0, 0)),
                ],
                out_specs=pl.BlockSpec((blk_res, d_padded),
                                       lambda b, ids: (b, 0)),
            ),
            compiler_params=pltpu.CompilerParams(
                # "arbitrary": keep one TC / one resident copy on v7x megacore.
                dimension_semantics=("arbitrary",),
                vmem_limit_bytes=int(max(resident_need, 32 << 20)),
            ),
        )(ids_padded, table_p)
        return out_padded[:B, :D]

    # --- default: per-row DMA gather (HBM traffic ~= B*D*itemsize) ------------
    blk_g = 8
    while blk_g < _GATHER_MAX_BLOCK and B >= 2 * blk_g:
        blk_g *= 2
    b_padded = _round_up(B, blk_g)
    num_blocks = b_padded // blk_g
    # Pad with a valid row id (0); padded output rows are sliced away below.
    ids_padded = jnp.zeros((b_padded,), jnp.int32).at[:B].set(flat_ids)

    out_padded = pl.pallas_call(
        functools.partial(_dma_gather_kernel, block_b=blk_g),
        out_shape=jax.ShapeDtypeStruct((b_padded, D), dtype),
        grid_spec=pltpu.PrefetchScalarGridSpec(
            num_scalar_prefetch=1,
            grid=(num_blocks,),
            in_specs=[pl.BlockSpec(memory_space=pl.ANY)],   # table stays in HBM
            out_specs=pl.BlockSpec((blk_g, D), lambda b, ids: (b, 0)),
            scratch_shapes=[pltpu.SemaphoreType.DMA((blk_g,))],
        ),
        compiler_params=pltpu.CompilerParams(
            dimension_semantics=("parallel",),   # disjoint output tiles
        ),
    )(ids_padded, flat_table)
    return out_padded[:B]


if __name__ == "__main__":
    # ---- deterministic synthetic setup (config['language_model'] == 'random') ----
    T = 3      # number of cached tasks
    R = 2      # descriptions cached per task
    D = 128    # config.random.task_embedding_dim
    B = 4      # number of task names requested in forward()

    key = jax.random.PRNGKey(0)
    k_emb, k_row, k_tasks = jax.random.split(key, 3)

    # Stand-in for self.task_to_embeddings: one [R, D] embedding per task, stacked.
    emb_table = jax.random.normal(k_emb, (T, R, D), dtype=jnp.float32)
    emb_np = np.asarray(emb_table)

    # Requested task names mapped to task ids; duplicates allowed.
    task_ids = jnp.array([0, 2, 1, 0], dtype=jnp.int32)

    # 1) randomize_task_emb_sampling=False -> always row 0.
    #    Small B => per-row DMA-gather Pallas path (force_pallas bypasses the
    #    tiny-output XLA fast path so the kernel is exercised).
    row_ids0 = jnp.zeros((B,), dtype=jnp.int32)
    out0 = task_embedding_forward(emb_table, task_ids, row_ids0, force_pallas=True)
    jax.block_until_ready(out0)
    ref0 = emb_np[np.asarray(task_ids), np.asarray(row_ids0), :]
    np.testing.assert_allclose(np.asarray(out0), ref0, rtol=0, atol=0)
    assert out0.shape == (B, D)

    # 2) randomize_task_emb_sampling=True -> random row precomputed on host
    #    (stand-in for np.random.choice in the PyTorch forward).
    row_ids1 = jax.random.randint(k_row, (B,), 0, R, dtype=jnp.int32)
    out1 = task_embedding_forward(emb_table, task_ids, row_ids1, force_pallas=True)
    jax.block_until_ready(out1)
    ref1 = emb_np[np.asarray(task_ids), np.asarray(row_ids1), :]
    np.testing.assert_allclose(np.asarray(out1), ref1, rtol=0, atol=0)

    # 3) batch re-reading the small table (B*D >= table) -> resident-table path
    #    with dense per-sublane-group stores.
    B2 = 32
    task_ids2 = jax.random.randint(k_tasks, (B2,), 0, T, dtype=jnp.int32)
    row_ids2 = jnp.zeros((B2,), dtype=jnp.int32)
    out2 = task_embedding_forward(emb_table, task_ids2, row_ids2, force_pallas=True)
    jax.block_until_ready(out2)
    ref2 = emb_np[np.asarray(task_ids2), np.asarray(row_ids2), :]
    np.testing.assert_allclose(np.asarray(out2), ref2, rtol=0, atol=0)

    # 4) default call on the tiny shipped config -> XLA gather fast path.
    out3 = task_embedding_forward(emb_table, task_ids, row_ids0)
    jax.block_until_ready(out3)
    np.testing.assert_allclose(np.asarray(out3), ref0, rtol=0, atol=0)

    # TODO(synk): string task-name -> id mapping and np.random row sampling stay
    # host-side (no Pallas equivalent for Python dict lookup / host RNG).
    print("KERNEL_OK")
</pallas_src>

<mosaic_0001>
module attributes {stable_mosaic.version = 11 : i64} {
  func.func @_dma_gather_kernel(%arg0: i32, %arg1: memref<8xi32, #tpu.memory_space<smem>>, %arg2: memref<6x128xf32, #tpu.memory_space<any>>, %arg3: memref<8x128xf32, #tpu.memory_space<vmem>>, %arg4: memref<8x!tpu.dma_semaphore, #tpu.memory_space<semaphore_mem>>) attributes {dimension_semantics = [#tpu.dimension_semantics<parallel>], iteration_bounds = array<i64: 1>, scalar_prefetch = 1 : i64, scratch_operands = 1 : i64, tpu.core_type = #tpu.core_type<tc>, window_params = [{}, {transform_indices = @transform_1, window_bounds = array<i64: 8, 128>}]} {
    %c8_i32 = arith.constant 8 : i32
    %0 = arith.muli %arg0, %c8_i32 : i32
    %1 = tpu.assume_multiple %0, 8 : i32
    %c0_i32 = arith.constant 0 : i32
    %2 = arith.addi %1, %c0_i32 : i32
    %3 = arith.index_cast %2 : i32 to index
    %4 = memref.load %arg1[%3] : memref<8xi32, #tpu.memory_space<smem>>
    %c0_i32_0 = arith.constant 0 : i32
    %c0_i32_1 = arith.constant 0 : i32
    %5 = tpu.memref_slice %arg2[%4, %c0_i32_1] : memref<6x128xf32, #tpu.memory_space<any>> -> memref<1x128xf32, #tpu.memory_space<any>>
    %c0_i32_2 = arith.constant 0 : i32
    %c0_i32_3 = arith.constant 0 : i32
    %6 = tpu.memref_slice %arg3[%c0_i32_2, %c0_i32_3] : memref<8x128xf32, #tpu.memory_space<vmem>> -> memref<1x128xf32, #tpu.memory_space<vmem>>
    %7 = tpu.memref_slice %arg4[%c0_i32_0] : memref<8x!tpu.dma_semaphore, #tpu.memory_space<semaphore_mem>> -> memref<1x!tpu.dma_semaphore, #tpu.memory_space<semaphore_mem>>
    %8 = tpu.memref_squeeze %7 : memref<1x!tpu.dma_semaphore, #tpu.memory_space<semaphore_mem>> -> memref<!tpu.dma_semaphore, #tpu.memory_space<semaphore_mem>>
    tpu.enqueue_dma source(%5 : memref<1x128xf32, #tpu.memory_space<any>>) target(%6 : memref<1x128xf32, #tpu.memory_space<vmem>>) target_semaphore(%8 : memref<!tpu.dma_semaphore, #tpu.memory_space<semaphore_mem>>)
    %c1_i32 = arith.constant 1 : i32
    %9 = arith.addi %1, %c1_i32 : i32
    %10 = arith.index_cast %9 : i32 to index
    %11 = memref.load %arg1[%10] : memref<8xi32, #tpu.memory_space<smem>>
    %c1_i32_4 = arith.constant 1 : i32
    %c0_i32_5 = arith.constant 0 : i32
    %12 = tpu.memref_slice %arg2[%11, %c0_i32_5] : memref<6x128xf32, #tpu.memory_space<any>> -> memref<1x128xf32, #tpu.memory_space<any>>
    %c1_i32_6 = arith.constant 1 : i32
    %c0_i32_7 = arith.constant 0 : i32
    %13 = tpu.memref_slice %arg3[%c1_i32_6, %c0_i32_7] : memref<8x128xf32, #tpu.memory_space<vmem>> -> memref<1x128xf32, #tpu.memory_space<vmem>>
    %14 = tpu.memref_slice %arg4[%c1_i32_4] : memref<8x!tpu.dma_semaphore, #tpu.memory_space<semaphore_mem>> -> memref<1x!tpu.dma_semaphore, #tpu.memory_space<semaphore_mem>>
    %15 = tpu.memref_squeeze %14 : memref<1x!tpu.dma_semaphore, #tpu.memory_space<semaphore_mem>> -> memref<!tpu.dma_semaphore, #tpu.memory_space<semaphore_mem>>
    tpu.enqueue_dma source(%12 : memref<1x128xf32, #tpu.memory_space<any>>) target(%13 : memref<1x128xf32, #tpu.memory_space<vmem>>) target_semaphore(%15 : memref<!tpu.dma_semaphore, #tpu.memory_space<semaphore_mem>>)
    %c2_i32 = arith.constant 2 : i32
    %16 = arith.addi %1, %c2_i32 : i32
    %17 = arith.index_cast %16 : i32 to index
    %18 = memref.load %arg1[%17] : memref<8xi32, #tpu.memory_space<smem>>
    %c2_i32_8 = arith.constant 2 : i32
    %c0_i32_9 = arith.constant 0 : i32
    %19 = tpu.memref_slice %arg2[%18, %c0_i32_9] : memref<6x128xf32, #tpu.memory_space<any>> -> memref<1x128xf32, #tpu.memory_space<any>>
    %c2_i32_10 = arith.constant 2 : i32
    %c0_i32_11 = arith.constant 0 : i32
    %20 = tpu.memref_slice %arg3[%c2_i32_10, %c0_i32_11] : memref<8x128xf32, #tpu.memory_space<vmem>> -> memref<1x128xf32, #tpu.memory_space<vmem>>
    %21 = tpu.memref_slice %arg4[%c2_i32_8] : memref<8x!tpu.dma_semaphore, #tpu.memory_space<semaphore_mem>> -> memref<1x!tpu.dma_semaphore, #tpu.memory_space<semaphore_mem>>
    %22 = tpu.memref_squeeze %21 : memref<1x!tpu.dma_semaphore, #tpu.memory_space<semaphore_mem>> -> memref<!tpu.dma_semaphore, #tpu.memory_space<semaphore_mem>>
    tpu.enqueue_dma source(%19 : memref<1x128xf32, #tpu.memory_space<any>>) target(%20 : memref<1x128xf32, #tpu.memory_space<vmem>>) target_semaphore(%22 : memref<!tpu.dma_semaphore, #tpu.memory_space<semaphore_mem>>)
    %c3_i32 = arith.constant 3 : i32
    %23 = arith.addi %1, %c3_i32 : i32
    %24 = arith.index_cast %23 : i32 to index
    %25 = memref.load %arg1[%24] : memref<8xi32, #tpu.memory_space<smem>>
    %c3_i32_12 = arith.constant 3 : i32
    %c0_i32_13 = arith.constant 0 : i32
    %26 = tpu.memref_slice %arg2[%25, %c0_i32_13] : memref<6x128xf32, #tpu.memory_space<any>> -> memref<1x128xf32, #tpu.memory_space<any>>
    %c3_i32_14 = arith.constant 3 : i32
    %c0_i32_15 = arith.constant 0 : i32
    %27 = tpu.memref_slice %arg3[%c3_i32_14, %c0_i32_15] : memref<8x128xf32, #tpu.memory_space<vmem>> -> memref<1x128xf32, #tpu.memory_space<vmem>>
    %28 = tpu.memref_slice %arg4[%c3_i32_12] : memref<8x!tpu.dma_semaphore, #tpu.memory_space<semaphore_mem>> -> memref<1x!tpu.dma_semaphore, #tpu.memory_space<semaphore_mem>>
    %29 = tpu.memref_squeeze %28 : memref<1x!tpu.dma_semaphore, #tpu.memory_space<semaphore_mem>> -> memref<!tpu.dma_semaphore, #tpu.memory_space<semaphore_mem>>
    tpu.enqueue_dma source(%26 : memref<1x128xf32, #tpu.memory_space<any>>) target(%27 : memref<1x128xf32, #tpu.memory_space<vmem>>) target_semaphore(%29 : memref<!tpu.dma_semaphore, #tpu.memory_space<semaphore_mem>>)
    %c4_i32 = arith.constant 4 : i32
    %30 = arith.addi %1, %c4_i32 : i32
    %31 = arith.index_cast %30 : i32 to index
    %32 = memref.load %arg1[%31] : memref<8xi32, #tpu.memory_space<smem>>
    %c4_i32_16 = arith.constant 4 : i32
    %c0_i32_17 = arith.constant 0 : i32
    %33 = tpu.memref_slice %arg2[%32, %c0_i32_17] : memref<6x128xf32, #tpu.memory_space<any>> -> memref<1x128xf32, #tpu.memory_space<any>>
    %c4_i32_18 = arith.constant 4 : i32
    %c0_i32_19 = arith.constant 0 : i32
    %34 = tpu.memref_slice %arg3[%c4_i32_18, %c0_i32_19] : memref<8x128xf32, #tpu.memory_space<vmem>> -> memref<1x128xf32, #tpu.memory_space<vmem>>
    %35 = tpu.memref_slice %arg4[%c4_i32_16] : memref<8x!tpu.dma_semaphore, #tpu.memory_space<semaphore_mem>> -> memref<1x!tpu.dma_semaphore, #tpu.memory_space<semaphore_mem>>
    %36 = tpu.memref_squeeze %35 : memref<1x!tpu.dma_semaphore, #tpu.memory_space<semaphore_mem>> -> memref<!tpu.dma_semaphore, #tpu.memory_space<semaphore_mem>>
    tpu.enqueue_dma source(%33 : memref<1x128xf32, #tpu.memory_space<any>>) target(%34 : memref<1x128xf32, #tpu.memory_space<vmem>>) target_semaphore(%36 : memref<!tpu.dma_semaphore, #tpu.memory_space<semaphore_mem>>)
    %c5_i32 = arith.constant 5 : i32
    %37 = arith.addi %1, %c5_i32 : i32
    %38 = arith.index_cast %37 : i32 to index
    %39 = memref.load %arg1[%38] : memref<8xi32, #tpu.memory_space<smem>>
    %c5_i32_20 = arith.constant 5 : i32
    %c0_i32_21 = arith.constant 0 : i32
    %40 = tpu.memref_slice %arg2[%39, %c0_i32_21] : memref<6x128xf32, #tpu.memory_space<any>> -> memref<1x128xf32, #tpu.memory_space<any>>
    %c5_i32_22 = arith.constant 5 : i32
    %c0_i32_23 = arith.constant 0 : i32
    %41 = tpu.memref_slice %arg3[%c5_i32_22, %c0_i32_23] : memref<8x128xf32, #tpu.memory_space<vmem>> -> memref<1x128xf32, #tpu.memory_space<vmem>>
    %42 = tpu.memref_slice %arg4[%c5_i32_20] : memref<8x!tpu.dma_semaphore, #tpu.memory_space<semaphore_mem>> -> memref<1x!tpu.dma_semaphore, #tpu.memory_space<semaphore_mem>>
    %43 = tpu.memref_squeeze %42 : memref<1x!tpu.dma_semaphore, #tpu.memory_space<semaphore_mem>> -> memref<!tpu.dma_semaphore, #tpu.memory_space<semaphore_mem>>
    tpu.enqueue_dma source(%40 : memref<1x128xf32, #tpu.memory_space<any>>) target(%41 : memref<1x128xf32, #tpu.memory_space<vmem>>) target_semaphore(%43 : memref<!tpu.dma_semaphore, #tpu.memory_space<semaphore_mem>>)
    %c6_i32 = arith.constant 6 : i32
    %44 = arith.addi %1, %c6_i32 : i32
    %45 = arith.index_cast %44 : i32 to index
    %46 = memref.load %arg1[%45] : memref<8xi32, #tpu.memory_space<smem>>
    %c6_i32_24 = arith.constant 6 : i32
    %c0_i32_25 = arith.constant 0 : i32
    %47 = tpu.memref_slice %arg2[%46, %c0_i32_25] : memref<6x128xf32, #tpu.memory_space<any>> -> memref<1x128xf32, #tpu.memory_space<any>>
    %c6_i32_26 = arith.constant 6 : i32
    %c0_i32_27 = arith.constant 0 : i32
    %48 = tpu.memref_slice %arg3[%c6_i32_26, %c0_i32_27] : memref<8x128xf32, #tpu.memory_space<vmem>> -> memref<1x128xf32, #tpu.memory_space<vmem>>
    %49 = tpu.memref_slice %arg4[%c6_i32_24] : memref<8x!tpu.dma_semaphore, #tpu.memory_space<semaphore_mem>> -> memref<1x!tpu.dma_semaphore, #tpu.memory_space<semaphore_mem>>
    %50 = tpu.memref_squeeze %49 : memref<1x!tpu.dma_semaphore, #tpu.memory_space<semaphore_mem>> -> memref<!tpu.dma_semaphore, #tpu.memory_space<semaphore_mem>>
    tpu.enqueue_dma source(%47 : memref<1x128xf32, #tpu.memory_space<any>>) target(%48 : memref<1x128xf32, #tpu.memory_space<vmem>>) target_semaphore(%50 : memref<!tpu.dma_semaphore, #tpu.memory_space<semaphore_mem>>)
    %c7_i32 = arith.constant 7 : i32
    %51 = arith.addi %1, %c7_i32 : i32
    %52 = arith.index_cast %51 : i32 to index
    %53 = memref.load %arg1[%52] : memref<8xi32, #tpu.memory_space<smem>>
    %c7_i32_28 = arith.constant 7 : i32
    %c0_i32_29 = arith.constant 0 : i32
    %54 = tpu.memref_slice %arg2[%53, %c0_i32_29] : memref<6x128xf32, #tpu.memory_space<any>> -> memref<1x128xf32, #tpu.memory_space<any>>
    %c7_i32_30 = arith.constant 7 : i32
    %c0_i32_31 = arith.constant 0 : i32
    %55 = tpu.memref_slice %arg3[%c7_i32_30, %c0_i32_31] : memref<8x128xf32, #tpu.memory_space<vmem>> -> memref<1x128xf32, #tpu.memory_space<vmem>>
    %56 = tpu.memref_slice %arg4[%c7_i32_28] : memref<8x!tpu.dma_semaphore, #tpu.memory_space<semaphore_mem>> -> memref<1x!tpu.dma_semaphore, #tpu.memory_space<semaphore_mem>>
    %57 = tpu.memref_squeeze %56 : memref<1x!tpu.dma_semaphore, #tpu.memory_space<semaphore_mem>> -> memref<!tpu.dma_semaphore, #tpu.memory_space<semaphore_mem>>
    tpu.enqueue_dma source(%54 : memref<1x128xf32, #tpu.memory_space<any>>) target(%55 : memref<1x128xf32, #tpu.memory_space<vmem>>) target_semaphore(%57 : memref<!tpu.dma_semaphore, #tpu.memory_space<semaphore_mem>>)
    %c0_i32_32 = arith.constant 0 : i32
    %c0_i32_33 = arith.constant 0 : i32
    %58 = tpu.memref_slice %arg2[%4, %c0_i32_33] : memref<6x128xf32, #tpu.memory_space<any>> -> memref<1x128xf32, #tpu.memory_space<any>>
    %c0_i32_34 = arith.constant 0 : i32
    %c0_i32_35 = arith.constant 0 : i32
    %59 = tpu.memref_slice %arg3[%c0_i32_34, %c0_i32_35] : memref<8x128xf32, #tpu.memory_space<vmem>> -> memref<1x128xf32, #tpu.memory_space<vmem>>
    %60 = tpu.memref_slice %arg4[%c0_i32_32] : memref<8x!tpu.dma_semaphore, #tpu.memory_space<semaphore_mem>> -> memref<1x!tpu.dma_semaphore, #tpu.memory_space<semaphore_mem>>
    %61 = tpu.memref_squeeze %60 : memref<1x!tpu.dma_semaphore, #tpu.memory_space<semaphore_mem>> -> memref<!tpu.dma_semaphore, #tpu.memory_space<semaphore_mem>>
    tpu.wait_dma2 semaphore(%61 : memref<!tpu.dma_semaphore, #tpu.memory_space<semaphore_mem>>) src(%58 : memref<1x128xf32, #tpu.memory_space<any>>) dst(%59 : memref<1x128xf32, #tpu.memory_space<vmem>>)
    %c1_i32_36 = arith.constant 1 : i32
    %c0_i32_37 = arith.constant 0 : i32
    %62 = tpu.memref_slice %arg2[%11, %c0_i32_37] : memref<6x128xf32, #tpu.memory_space<any>> -> memref<1x128xf32, #tpu.memory_space<any>>
    %c1_i32_38 = arith.constant 1 : i32
    %c0_i32_39 = arith.constant 0 : i32
    %63 = tpu.memref_slice %arg3[%c1_i32_38, %c0_i32_39] : memref<8x128xf32, #tpu.memory_space<vmem>> -> memref<1x128xf32, #tpu.memory_space<vmem>>
    %64 = tpu.memref_slice %arg4[%c1_i32_36] : memref<8x!tpu.dma_semaphore, #tpu.memory_space<semaphore_mem>> -> memref<1x!tpu.dma_semaphore, #tpu.memory_space<semaphore_mem>>
    %65 = tpu.memref_squeeze %64 : memref<1x!tpu.dma_semaphore, #tpu.memory_space<semaphore_mem>> -> memref<!tpu.dma_semaphore, #tpu.memory_space<semaphore_mem>>
    tpu.wait_dma2 semaphore(%65 : memref<!tpu.dma_semaphore, #tpu.memory_space<semaphore_mem>>) src(%62 : memref<1x128xf32, #tpu.memory_space<any>>) dst(%63 : memref<1x128xf32, #tpu.memory_space<vmem>>)
    %c2_i32_40 = arith.constant 2 : i32
    %c0_i32_41 = arith.constant 0 : i32
    %66 = tpu.memref_slice %arg2[%18, %c0_i32_41] : memref<6x128xf32, #tpu.memory_space<any>> -> memref<1x128xf32, #tpu.memory_space<any>>
    %c2_i32_42 = arith.constant 2 : i32
    %c0_i32_43 = arith.constant 0 : i32
    %67 = tpu.memref_slice %arg3[%c2_i32_42, %c0_i32_43] : memref<8x128xf32, #tpu.memory_space<vmem>> -> memref<1x128xf32, #tpu.memory_space<vmem>>
    %68 = tpu.memref_slice %arg4[%c2_i32_40] : memref<8x!tpu.dma_semaphore, #tpu.memory_space<semaphore_mem>> -> memref<1x!tpu.dma_semaphore, #tpu.memory_space<semaphore_mem>>
    %69 = tpu.memref_squeeze %68 : memref<1x!tpu.dma_semaphore, #tpu.memory_space<semaphore_mem>> -> memref<!tpu.dma_semaphore, #tpu.memory_space<semaphore_mem>>
    tpu.wait_dma2 semaphore(%69 : memref<!tpu.dma_semaphore, #tpu.memory_space<semaphore_mem>>) src(%66 : memref<1x128xf32, #tpu.memory_space<any>>) dst(%67 : memref<1x128xf32, #tpu.memory_space<vmem>>)
    %c3_i32_44 = arith.constant 3 : i32
    %c0_i32_45 = arith.constant 0 : i32
    %70 = tpu.memref_slice %arg2[%25, %c0_i32_45] : memref<6x128xf32, #tpu.memory_space<any>> -> memref<1x128xf32, #tpu.memory_space<any>>
    %c3_i32_46 = arith.constant 3 : i32
    %c0_i32_47 = arith.constant 0 : i32
    %71 = tpu.memref_slice %arg3[%c3_i32_46, %c0_i32_47] : memref<8x128xf32, #tpu.memory_space<vmem>> -> memref<1x128xf32, #tpu.memory_space<vmem>>
    %72 = tpu.memref_slice %arg4[%c3_i32_44] : memref<8x!tpu.dma_semaphore, #tpu.memory_space<semaphore_mem>> -> memref<1x!tpu.dma_semaphore, #tpu.memory_space<semaphore_mem>>
    %73 = tpu.memref_squeeze %72 : memref<1x!tpu.dma_semaphore, #tpu.memory_space<semaphore_mem>> -> memref<!tpu.dma_semaphore, #tpu.memory_space<semaphore_mem>>
    tpu.wait_dma2 semaphore(%73 : memref<!tpu.dma_semaphore, #tpu.memory_space<semaphore_mem>>) src(%70 : memref<1x128xf32, #tpu.memory_space<any>>) dst(%71 : memref<1x128xf32, #tpu.memory_space<vmem>>)
    %c4_i32_48 = arith.constant 4 : i32
    %c0_i32_49 = arith.constant 0 : i32
    %74 = tpu.memref_slice %arg2[%32, %c0_i32_49] : memref<6x128xf32, #tpu.memory_space<any>> -> memref<1x128xf32, #tpu.memory_space<any>>
    %c4_i32_50 = arith.constant 4 : i32
    %c0_i32_51 = arith.constant 0 : i32
    %75 = tpu.memref_slice %arg3[%c4_i32_50, %c0_i32_51] : memref<8x128xf32, #tpu.memory_space<vmem>> -> memref<1x128xf32, #tpu.memory_space<vmem>>
    %76 = tpu.memref_slice %arg4[%c4_i32_48] : memref<8x!tpu.dma_semaphore, #tpu.memory_space<semaphore_mem>> -> memref<1x!tpu.dma_semaphore, #tpu.memory_space<semaphore_mem>>
    %77 = tpu.memref_squeeze %76 : memref<1x!tpu.dma_semaphore, #tpu.memory_space<semaphore_mem>> -> memref<!tpu.dma_semaphore, #tpu.memory_space<semaphore_mem>>
    tpu.wait_dma2 semaphore(%77 : memref<!tpu.dma_semaphore, #tpu.memory_space<semaphore_mem>>) src(%74 : memref<1x128xf32, #tpu.memory_space<any>>) dst(%75 : memref<1x128xf32, #tpu.memory_space<vmem>>)
    %c5_i32_52 = arith.constant 5 : i32
    %c0_i32_53 = arith.constant 0 : i32
    %78 = tpu.memref_slice %arg2[%39, %c0_i32_53] : memref<6x128xf32, #tpu.memory_space<any>> -> memref<1x128xf32, #tpu.memory_space<any>>
    %c5_i32_54 = arith.constant 5 : i32
    %c0_i32_55 = arith.constant 0 : i32
    %79 = tpu.memref_slice %arg3[%c5_i32_54, %c0_i32_55] : memref<8x128xf32, #tpu.memory_space<vmem>> -> memref<1x128xf32, #tpu.memory_space<vmem>>
    %80 = tpu.memref_slice %arg4[%c5_i32_52] : memref<8x!tpu.dma_semaphore, #tpu.memory_space<semaphore_mem>> -> memref<1x!tpu.dma_semaphore, #tpu.memory_space<semaphore_mem>>
    %81 = tpu.memref_squeeze %80 : memref<1x!tpu.dma_semaphore, #tpu.memory_space<semaphore_mem>> -> memref<!tpu.dma_semaphore, #tpu.memory_space<semaphore_mem>>
    tpu.wait_dma2 semaphore(%81 : memref<!tpu.dma_semaphore, #tpu.memory_space<semaphore_mem>>) src(%78 : memref<1x128xf32, #tpu.memory_space<any>>) dst(%79 : memref<1x128xf32, #tpu.memory_space<vmem>>)
    %c6_i32_56 = arith.constant 6 : i32
    %c0_i32_57 = arith.constant 0 : i32
    %82 = tpu.memref_slice %arg2[%46, %c0_i32_57] : memref<6x128xf32, #tpu.memory_space<any>> -> memref<1x128xf32, #tpu.memory_space<any>>
    %c6_i32_58 = arith.constant 6 : i32
    %c0_i32_59 = arith.constant 0 : i32
    %83 = tpu.memref_slice %arg3[%c6_i32_58, %c0_i32_59] : memref<8x128xf32, #tpu.memory_space<vmem>> -> memref<1x128xf32, #tpu.memory_space<vmem>>
    %84 = tpu.memref_slice %arg4[%c6_i32_56] : memref<8x!tpu.dma_semaphore, #tpu.memory_space<semaphore_mem>> -> memref<1x!tpu.dma_semaphore, #tpu.memory_space<semaphore_mem>>
    %85 = tpu.memref_squeeze %84 : memref<1x!tpu.dma_semaphore, #tpu.memory_space<semaphore_mem>> -> memref<!tpu.dma_semaphore, #tpu.memory_space<semaphore_mem>>
    tpu.wait_dma2 semaphore(%85 : memref<!tpu.dma_semaphore, #tpu.memory_space<semaphore_mem>>) src(%82 : memref<1x128xf32, #tpu.memory_space<any>>) dst(%83 : memref<1x128xf32, #tpu.memory_space<vmem>>)
    %c7_i32_60 = arith.constant 7 : i32
    %c0_i32_61 = arith.constant 0 : i32
    %86 = tpu.memref_slice %arg2[%53, %c0_i32_61] : memref<6x128xf32, #tpu.memory_space<any>> -> memref<1x128xf32, #tpu.memory_space<any>>
    %c7_i32_62 = arith.constant 7 : i32
    %c0_i32_63 = arith.constant 0 : i32
    %87 = tpu.memref_slice %arg3[%c7_i32_62, %c0_i32_63] : memref<8x128xf32, #tpu.memory_space<vmem>> -> memref<1x128xf32, #tpu.memory_space<vmem>>
    %88 = tpu.memref_slice %arg4[%c7_i32_60] : memref<8x!tpu.dma_semaphore, #tpu.memory_space<semaphore_mem>> -> memref<1x!tpu.dma_semaphore, #tpu.memory_space<semaphore_mem>>
    %89 = tpu.memref_squeeze %88 : memref<1x!tpu.dma_semaphore, #tpu.memory_space<semaphore_mem>> -> memref<!tpu.dma_semaphore, #tpu.memory_space<semaphore_mem>>
    tpu.wait_dma2 semaphore(%89 : memref<!tpu.dma_semaphore, #tpu.memory_space<semaphore_mem>>) src(%86 : memref<1x128xf32, #tpu.memory_space<any>>) dst(%87 : memref<1x128xf32, #tpu.memory_space<vmem>>)
    return
  }
  func.func @transform_1(%arg0: i32, %arg1: memref<8xi32, #tpu.memory_space<smem>>) -> (i32, i32) {
    %c0_i32 = arith.constant 0 : i32
    %c0_i32_0 = arith.constant 0 : i32
    return %arg0, %c0_i32 : i32, i32
  }
}

</mosaic_0001>

<bundles_post_ra>
// kernel: tpu_custom_call.1
= control target key start
LH: loop header
LB: loop body
LE: loop exit
PB: predicated region body
PF: predicated region fallthrough
CT: control target
= control target key end

     0   :  { %s504_s9 = smov [#allocation4]   ;;  %s667_s0 = inlined_call_operand.hbm [shape: s32[8], index: 0, kind: input, shape index: {}]   ;;  %s668_s1 = inlined_call_operand.hbm [shape: f32[6,128], index: 1, kind: input, shape index: {}]   ;;  %s669_s2 = inlined_call_operand.hbm [shape: f32[8,128], index: 2, kind: output, shape index: {}]  }
   0x1   :  { %8 = dma.hbm_to_smem %s667_s0, 16, %s504_s9, [#allocation3] }
   0x2   :  { %484 = dma.done.wait [#allocation3], 16 }
   0x3   :  { %485 = vsyncadd [#allocation3], 4294967280 }
   0x4   :  { %10 = sfence }
   0x5   :  { %11 = vsyncpa [#allocation6], 0  ;;  %s13_s12 = sld [smem:[#allocation4]]  ;;  %s505_s13 = smov [#allocation5]  }
   0x6   :  { %s23_s14 = sshll.u32 %s505_s13, 4  ;;  %s531_s15 = sld [smem:[#allocation4 + $0x1]]  ;;  %s533_s14 = int_to_ptr.vmem [resolvable:$true] %s23_s14 }
   0x7   :  { %s506_s16 = smov [#allocation5 + $0x1]   ;;  %s535_s18 = sld [smem:[#allocation4 + $0x2]] }
   0x8   :  { %s40_s17 = sshll.u32 %s506_s16, 4  ;;  %s507_s19 = smov [#allocation5 + $0x2]   ;;  %s537_s17 = int_to_ptr.vmem [resolvable:$true] %s40_s17 }
   0x9   :  { %s57_s0 = sshll.u32 %s507_s19, 4  ;;  %s539_s20 = sld [smem:[#allocation4 + $0x3]]  ;;  %s541_s0 = int_to_ptr.vmem [resolvable:$true] %s57_s0 }
   0xa   :  { %s550_s29 = scalar_lea.hbm %s668_s1, 128 }
   0xb   :  { %s248_s21 = sshll.u32 %s13_s12, 4 }
   0xc   :  { %s15_s24 = scalar_lea.hbm %s668_s1, %s248_s21  ;;  %s250_s25 = sshll.u32 %s531_s15, 4 }
   0xd   :  { %s288_s26 = scalar_lea.hbm %s15_s24, 16  ;;  %p291_p1 = scmp.lt.s32.totalorder %s15_s24, %s668_s1 }
   0xe   :  { %p289_p0 = scmp.ne.s32.totalorder %s15_s24, %s288_s26  ;;  %p292_p2 = scmp.lt.s32.totalorder %s550_s29, %s288_s26 }
  0x10   :  { %p293_p3 = por %p292_p2, %p291_p1 }
  0x12   :  { %p294_p4 = pnand %p293_p3, %p289_p0 }
  0x14   :  { %297 = shalt.err (!%p294_p4)  }
  0x15   :  { %s298_s4 = scalar_lea.vmem %s533_s14, 16  ;;  %s559_s5 = scalar_lea.vmem %s533_s14, 128 }
  0x16   :  { %p299_p5 = scmp.ne.s32.totalorder %s533_s14, %s298_s4  ;;  %p303_p6 = scmp.lt.s32.totalorder %s533_s14, %s533_s14 }
  0x17   :  { %p304_p7 = scmp.lt.s32.totalorder %s559_s5, %s298_s4 }
  0x19   :  { %p305_p8 = por %p304_p7, %p303_p6 }
  0x1b   :  { %p306_p9 = pnand %p305_p8, %p299_p5 }
  0x1d   :  { %309 = shalt.err (!%p306_p9)  }
  0x1e   :  { %26 = dma.hbm_to_vmem [thread:$0]  %s15_s24, 16, %s533_s14, [#allocation2] }
  0x1f   :  { %s30_s8 = scalar_lea.hbm %s668_s1, %s250_s25  ;;  %s252_s9 = sshll.u32 %s535_s18, 4 }
  0x20   :  { %s310_s10 = scalar_lea.hbm %s30_s8, 16  ;;  %p313_p11 = scmp.lt.s32.totalorder %s30_s8, %s668_s1 }
  0x21   :  { %p311_p10 = scmp.ne.s32.totalorder %s30_s8, %s310_s10  ;;  %p314_p12 = scmp.lt.s32.totalorder %s550_s29, %s310_s10 }
  0x23   :  { %p315_p13 = por %p314_p12, %p313_p11 }
  0x25   :  { %p316_p0 = pnand %p315_p13, %p311_p10 }
  0x27   :  { %319 = shalt.err (!%p316_p0)  }
  0x28   :  { %s320_s13 = scalar_lea.vmem %s537_s17, 16  ;;  %p325_p2 = scmp.lt.s32.totalorder %s537_s17, %s533_s14 }
  0x29   :  { %p321_p1 = scmp.ne.s32.totalorder %s537_s17, %s320_s13  ;;  %p326_p3 = scmp.lt.s32.totalorder %s559_s5, %s320_s13 }
  0x2b   :  { %p327_p4 = por %p326_p3, %p325_p2 }
  0x2d   :  { %p328_p5 = pnand %p327_p4, %p321_p1 }
  0x2f   :  { %331 = shalt.err (!%p328_p5)  }
  0x30   :  { %43 = dma.hbm_to_vmem [thread:$0]  %s30_s8, 16, %s537_s17, [#allocation2 + $0x1] }
  0x31   :  { %s47_s18 = scalar_lea.hbm %s668_s1, %s252_s9  ;;  %s254_s19 = sshll.u32 %s539_s20, 4 }
  0x32   :  { %s332_s21 = scalar_lea.hbm %s47_s18, 16  ;;  %p335_p8 = scmp.lt.s32.totalorder %s47_s18, %s668_s1 }
  0x33   :  { %p333_p7 = scmp.ne.s32.totalorder %s47_s18, %s332_s21  ;;  %p336_p9 = scmp.lt.s32.totalorder %s550_s29, %s332_s21 }
  0x35   :  { %p337_p10 = por %p336_p9, %p335_p8 }
  0x37   :  { %p338_p11 = pnand %p337_p10, %p333_p7 }
  0x39   :  { %341 = shalt.err (!%p338_p11)  }
  0x3a   :  { %s342_s17 = scalar_lea.vmem %s541_s0, 16  ;;  %p347_p13 = scmp.lt.s32.totalorder %s541_s0, %s533_s14 }
  0x3b   :  { %p343_p12 = scmp.ne.s32.totalorder %s541_s0, %s342_s17  ;;  %p348_p0 = scmp.lt.s32.totalorder %s559_s5, %s342_s17 }
  0x3d   :  { %p349_p1 = por %p348_p0, %p347_p13 }
  0x3f   :  { %p350_p2 = pnand %p349_p1, %p343_p12 }
  0x41   :  { %353 = shalt.err (!%p350_p2)  }
  0x42   :  { %60 = dma.hbm_to_vmem [thread:$0]  %s47_s18, 16, %s541_s0, [#allocation2 + $0x2] }
  0x43   :  { %s64_s25 = scalar_lea.hbm %s668_s1, %s254_s19  ;;  %s508_s26 = smov [#allocation5 + $0x3]  }
  0x44   :  { %s74_s27 = sshll.u32 %s508_s26, 4  ;;  %s255_s28 = sld [smem:[#allocation4 + $0x4]]  ;;  %s75_s27 = int_to_ptr.vmem [resolvable:$true] %s74_s27 }
  0x45   :  { %s354_s30 = scalar_lea.hbm %s64_s25, 16  ;;  %p357_p4 = scmp.lt.s32.totalorder %s64_s25, %s668_s1 }
  0x46   :  { %p355_p3 = scmp.ne.s32.totalorder %s64_s25, %s354_s30  ;;  %p358_p5 = scmp.lt.s32.totalorder %s550_s29, %s354_s30 }
  0x48   :  { %p359_p7 = por %p358_p5, %p357_p4 }
  0x4a   :  { %p360_p8 = pnand %p359_p7, %p355_p3 }
  0x4c   :  { %363 = shalt.err (!%p360_p8)  }
  0x4d   :  { %s364_s6 = scalar_lea.vmem %s75_s27, 16  ;;  %p369_p10 = scmp.lt.s32.totalorder %s75_s27, %s533_s14 }
  0x4e   :  { %p365_p9 = scmp.ne.s32.totalorder %s75_s27, %s364_s6  ;;  %p370_p11 = scmp.lt.s32.totalorder %s559_s5, %s364_s6 }
  0x50   :  { %p371_p12 = por %p370_p11, %p369_p10 }
  0x52   :  { %p372_p13 = pnand %p371_p12, %p365_p9 }
  0x54   :  { %375 = shalt.err (!%p372_p13)  }
  0x55   :  { %77 = dma.hbm_to_vmem [thread:$0]  %s64_s25, 16, %s75_s27, [#allocation2 + $0x3] }
  0x56   :  { %s509_s0 = smov [#allocation5 + $0x4]   ;;  %s257_s8 = sld [smem:[#allocation4 + $0x5]] }
  0x57   :  { %s91_s7 = sshll.u32 %s509_s0, 4  ;;  %s510_s9 = smov [#allocation5 + $0x5]   ;;  %s92_s7 = int_to_ptr.vmem [resolvable:$true] %s91_s7 }
  0x58   :  { %s108_s10 = sshll.u32 %s510_s9, 4  ;;  %s605_s11 = sld [smem:[#allocation4 + $0x6]]  ;;  %s607_s10 = int_to_ptr.vmem [resolvable:$true] %s108_s10 }
  0x59   :  { %s256_s12 = sshll.u32 %s255_s28, 4 }
  0x5a   :  { %s81_s16 = scalar_lea.hbm %s668_s1, %s256_s12 }
  0x5b   :  { %s376_s18 = scalar_lea.hbm %s81_s16, 16  ;;  %p379_p1 = scmp.lt.s32.totalorder %s81_s16, %s668_s1 }
  0x5c   :  { %p377_p0 = scmp.ne.s32.totalorder %s81_s16, %s376_s18  ;;  %p380_p2 = scmp.lt.s32.totalorder %s550_s29, %s376_s18 }
  0x5e   :  { %p381_p3 = por %p380_p2, %p379_p1 }
  0x60   :  { %p382_p4 = pnand %p381_p3, %p377_p0 }
  0x62   :  { %385 = shalt.err (!%p382_p4)  }
  0x63   :  { %s386_s22 = scalar_lea.vmem %s92_s7, 16  ;;  %p391_p7 = scmp.lt.s32.totalorder %s92_s7, %s533_s14 }
  0x64   :  { %p387_p5 = scmp.ne.s32.totalorder %s92_s7, %s386_s22  ;;  %p392_p8 = scmp.lt.s32.totalorder %s559_s5, %s386_s22 }
  0x66   :  { %p393_p9 = por %p392_p8, %p391_p7 }
  0x68   :  { %p394_p10 = pnand %p393_p9, %p387_p5 }
  0x6a   :  { %397 = shalt.err (!%p394_p10)  }
  0x6b   :  { %94 = dma.hbm_to_vmem [thread:$0]  %s81_s16, 16, %s92_s7, [#allocation2 + $0x4] }
  0x6c   :  { %s258_s23 = sshll.u32 %s257_s8, 4  ;;  %s511_s17 = smov [#allocation5 + $0x6]  }
  0x6d   :  { %s125_s20 = sshll.u32 %s511_s17, 4  ;;  %s98_s26 = scalar_lea.hbm %s668_s1, %s258_s23  ;;  %s621_s20 = int_to_ptr.vmem [resolvable:$true] %s125_s20 }
  0x6e   :  { %s398_s27 = scalar_lea.hbm %s98_s26, 16  ;;  %p401_p12 = scmp.lt.s32.totalorder %s98_s26, %s668_s1 }
  0x6f   :  { %p399_p11 = scmp.ne.s32.totalorder %s98_s26, %s398_s27  ;;  %p402_p13 = scmp.lt.s32.totalorder %s550_s29, %s398_s27 }
  0x71   :  { %p403_p0 = por %p402_p13, %p401_p12 }
  0x73   :  { %p404_p1 = pnand %p403_p0, %p399_p11 }
  0x75   :  { %407 = shalt.err (!%p404_p1)  }
  0x76   :  { %s408_s3 = scalar_lea.vmem %s607_s10, 16  ;;  %p413_p3 = scmp.lt.s32.totalorder %s607_s10, %s533_s14 }
  0x77   :  { %p409_p2 = scmp.ne.s32.totalorder %s607_s10, %s408_s3  ;;  %p414_p4 = scmp.lt.s32.totalorder %s559_s5, %s408_s3 }
  0x79   :  { %p415_p5 = por %p414_p4, %p413_p3 }
  0x7b   :  { %p416_p7 = pnand %p415_p5, %p409_p2 }
  0x7d   :  { %419 = shalt.err (!%p416_p7)  }
  0x7e   :  { %111 = dma.hbm_to_vmem [thread:$0]  %s98_s26, 16, %s607_s10, [#allocation2 + $0x5] }
  0x7f   :  { %s260_s4 = sshll.u32 %s605_s11, 4  ;;  %s261_s6 = sld [smem:[#allocation4 + $0x7]] }
  0x80   :  { %s115_s8 = scalar_lea.hbm %s668_s1, %s260_s4 }
  0x81   :  { %s420_s9 = scalar_lea.hbm %s115_s8, 16  ;;  %p423_p9 = scmp.lt.s32.totalorder %s115_s8, %s668_s1 }
  0x82   :  { %p421_p8 = scmp.ne.s32.totalorder %s115_s8, %s420_s9  ;;  %p424_p10 = scmp.lt.s32.totalorder %s550_s29, %s420_s9 }
  0x84   :  { %p425_p11 = por %p424_p10, %p423_p9 }
  0x86   :  { %p426_p12 = pnand %p425_p11, %p421_p8 }
  0x88   :  { %429 = shalt.err (!%p426_p12)  }
  0x89   :  { %s430_s10 = scalar_lea.vmem %s621_s20, 16  ;;  %p435_p0 = scmp.lt.s32.totalorder %s621_s20, %s533_s14 }
  0x8a   :  { %p431_p13 = scmp.ne.s32.totalorder %s621_s20, %s430_s10  ;;  %p436_p1 = scmp.lt.s32.totalorder %s559_s5, %s430_s10 }
  0x8c   :  { %p437_p2 = por %p436_p1, %p435_p0 }
  0x8e   :  { %p438_p3 = pnand %p437_p2, %p431_p13 }
  0x90   :  { %441 = shalt.err (!%p438_p3)  }
  0x91   :  { %128 = dma.hbm_to_vmem [thread:$0]  %s115_s8, 16, %s621_s20, [#allocation2 + $0x6] }
  0x92   :  { %s512_s11 = smov [#allocation5 + $0x7]   ;;  %s262_s16 = sshll.u32 %s261_s6, 4 }
  0x93   :  { %s142_s15 = sshll.u32 %s512_s11, 4  ;;  %s132_s21 = scalar_lea.hbm %s668_s1, %s262_s16  ;;  %s143_s15 = int_to_ptr.vmem [resolvable:$true] %s142_s15 }
  0x94   :  { %s442_s22 = scalar_lea.hbm %s132_s21, 16  ;;  %p445_p5 = scmp.lt.s32.totalorder %s132_s21, %s668_s1 }
  0x95   :  { %p443_p4 = scmp.ne.s32.totalorder %s132_s21, %s442_s22  ;;  %p446_p7 = scmp.lt.s32.totalorder %s550_s29, %s442_s22 }
  0x97   :  { %p447_p8 = por %p446_p7, %p445_p5 }
  0x99   :  { %p448_p9 = pnand %p447_p8, %p443_p4 }
  0x9b   :  { %451 = shalt.err (!%p448_p9)  }
  0x9c   :  { %s452_s24 = scalar_lea.vmem %s143_s15, 16  ;;  %p457_p11 = scmp.lt.s32.totalorder %s143_s15, %s533_s14 }
  0x9d   :  { %p453_p10 = scmp.ne.s32.totalorder %s143_s15, %s452_s24  ;;  %p458_p12 = scmp.lt.s32.totalorder %s559_s5, %s452_s24 }
  0x9f   :  { %p459_p13 = por %p458_p12, %p457_p11 }
  0xa1   :  { %p460_p0 = pnand %p459_p13, %p453_p10 }
  0xa3   :  { %463 = shalt.err (!%p460_p0)  }
  0xa4   :  { %145 = dma.hbm_to_vmem [thread:$0]  %s132_s21, 16, %s143_s15, [#allocation2 + $0x7] }
  0xa5   :  { %486 = dma.done.wait [#allocation2], 16 }
  0xa6   :  { %487 = vsyncadd [#allocation2], 4294967280 }
  0xa7   :  { %488 = dma.done.wait [#allocation2 + $0x1], 16 }
  0xa8   :  { %489 = vsyncadd [#allocation2 + $0x1], 4294967280 }
  0xa9   :  { %490 = dma.done.wait [#allocation2 + $0x2], 16 }
  0xaa   :  { %491 = vsyncadd [#allocation2 + $0x2], 4294967280 }
  0xab   :  { %492 = dma.done.wait [#allocation2 + $0x3], 16 }
  0xac   :  { %493 = vsyncadd [#allocation2 + $0x3], 4294967280 }
  0xad   :  { %494 = dma.done.wait [#allocation2 + $0x4], 16 }
  0xae   :  { %495 = vsyncadd [#allocation2 + $0x4], 4294967280 }
  0xaf   :  { %496 = dma.done.wait [#allocation2 + $0x5], 16 }
  0xb0   :  { %497 = vsyncadd [#allocation2 + $0x5], 4294967280 }
  0xb1   :  { %498 = dma.done.wait [#allocation2 + $0x6], 16 }
  0xb2   :  { %499 = vsyncadd [#allocation2 + $0x6], 4294967280 }
  0xb3   :  { %500 = dma.done.wait [#allocation2 + $0x7], 16 }
  0xb4   :  { %501 = vsyncadd [#allocation2 + $0x7], 4294967280  ;;  %p465_p1 = scmp.ne.s32.totalorder %s533_s14, %s559_s5  ;;  %p470_p2 = scmp.lt.s32.totalorder %s559_s5, %s559_s5 }
  0xb6   :  { %p471_p3 = por %p470_p2, %p303_p6 }
  0xb8   :  { %p472_p4 = pnand %p471_p3, %p465_p1 }
  0xba   :  { %475 = shalt.err (!%p472_p4)
}
  0xbb   :  { %172 = dma.vmem_to_hbm [thread:$0]  %s533_s14, 128, %s669_s2, [#allocation6]  }
  0xbc   :  { %502 = dma.done.wait [#allocation6], 128  }
  0xbd   :  { %503 = vsyncadd [#allocation6], 4294967168 }
  0xbe   :  { %176 = vsyncpa [#allocation6], 1 }
  0xbf   :  { %177 = vsyncmov [#allocation2] }
  0xc2   :  { %s178_s20 = vpop.sfrf %177 }
  0xc3   :  { %p263_p5 = scmp.ne.s32.totalorder %s178_s20, 0 }
  0xc5   :  { %182 = shalt.err (%p263_p5)  }
  0xc6   :  { %184 = vsyncmov [#allocation2 + $0x1] }
  0xc9   :  { %s185_s25 = vpop.sfrf %184 }
  0xca   :  { %p264_p7 = scmp.ne.s32.totalorder %s185_s25, 0 }
  0xcc   :  { %189 = shalt.err (%p264_p7)  }
  0xcd   :  { %191 = vsyncmov [#allocation2 + $0x2] }
  0xd0   :  { %s192_s5 = vpop.sfrf %191 }
  0xd1   :  { %p265_p6 = scmp.ne.s32.totalorder %s192_s5, 0 }
  0xd3   :  { %196 = shalt.err (%p265_p6)  }
  0xd4   :  { %198 = vsyncmov [#allocation2 + $0x3] }
  0xd7   :  { %s199_s26 = vpop.sfrf %198 }
  0xd8   :  { %p266_p8 = scmp.ne.s32.totalorder %s199_s26, 0 }
  0xda   :  { %203 = shalt.err (%p266_p8)  }
  0xdb   :  { %205 = vsyncmov [#allocation2 + $0x4] }
  0xde   :  { %s206_s2 = vpop.sfrf %205 }
  0xdf   :  { %p267_p9 = scmp.ne.s32.totalorder %s206_s2, 0 }
  0xe1   :  { %210 = shalt.err (%p267_p9)  }
  0xe2   :  { %212 = vsyncmov [#allocation2 + $0x5] }
  0xe5   :  { %s213_s14 = vpop.sfrf %212 }
  0xe6   :  { %p268_p10 = scmp.ne.s32.totalorder %s213_s14, 0 }
  0xe8   :  { %217 = shalt.err (%p268_p10)  }
  0xe9   :  { %219 = vsyncmov [#allocation2 + $0x6] }
  0xec   :  { %s220_s27 = vpop.sfrf %219 }
  0xed   :  { %p269_p11 = scmp.ne.s32.totalorder %s220_s27, 0 }
  0xef   :  { %224 = shalt.err (%p269_p11)  }
  0xf0   :  { %226 = vsyncmov [#allocation2 + $0x7] }
  0xf3   :  { %s227_s28 = vpop.sfrf %226 }
  0xf4   :  { %p270_p12 = scmp.ne.s32.totalorder %s227_s28, 0 }
  0xf6   :  { %231 = shalt.err (%p270_p12)  }

</bundles_post_ra>
